<compile_context>
chip_gen: v6e
topology: v6e:2x2x1
jax: 0.10.0
libtpu: 0.0.40
codegen_flags: <defaults>
</compile_context>

<pallas_src>
import functools

import jax
import jax.numpy as jnp
from jax.experimental import pallas as pl
from jax.experimental.pallas import tpu as pltpu


# ----------------------------------------------------------------------------
# Kernel: operates on a (C, TM) token-on-lanes tile of one batch element.
# ----------------------------------------------------------------------------
def _attention_kernel(g_ref, x_ref, wgT_ref, wxT_ref, b_ref, wp_ref, bp_ref,
                      o_ref, *, f32_epilogue: bool):
    # g_ref: (F_g, TM)   x_ref: (F_l, TM)   (native dtype, fed to MXU as-is)
    g = g_ref[...]
    x = x_ref[...]

    # 1x1 convs == matmuls with tokens on lanes (lane-dense outputs).
    # (F_int, F_g) @ (F_g, TM) + (F_int, F_l) @ (F_l, TM) + folded f32 bias.
    gx = (jnp.dot(wgT_ref[...], g, preferred_element_type=jnp.float32)
          + jnp.dot(wxT_ref[...], x, preferred_element_type=jnp.float32)
          + b_ref[...])                                  # (F_int, TM) f32

    psi = jnp.maximum(gx, 0.0)                           # ReLU

    # psi 1x1 conv (output channels == 1): an M=1 MXU matmul wastes 127/255
    # of the MXU rows, so do it on the VPU (multiply) + XLU (sublane reduce),
    # which are otherwise idle here.  wp_ref is (F_int, 1) f32 (cast hoisted).
    logits = jnp.sum(psi * wp_ref[...], axis=0, keepdims=True) + bp_ref[...]
    alpha = jax.nn.sigmoid(logits)                       # (1, TM) f32

    # broadcast over channels (sublanes); store lane-dense.
    if f32_epilogue:
        o_ref[...] = (x.astype(jnp.float32) * alpha).astype(o_ref.dtype)
    else:
        # bf16 multiply (native on v6e/v7x VPUs); alpha stays f32 up to here.
        o_ref[...] = x * alpha.astype(x.dtype)


# ----------------------------------------------------------------------------
# Tile-size / VMEM heuristics
# ----------------------------------------------------------------------------
def _round_up(a, b):
    return ((a + b - 1) // b) * b


def _vmem_capacity_bytes():
    """Generation-aware VMEM capacity (128 MiB v5e/v6e, 64 MiB v7x per TC)."""
    try:
        cap = getattr(pltpu.get_tpu_info(), "vmem_capacity_bytes", None)
        if cap:
            return int(cap)
    except Exception:
        pass
    return 64 << 20   # conservative fallback (v7x per-TensorCore)


def _choose_tile_m(L, N, F_g, F_l, F_int, in_item, w_item, f32_epilogue,
                   budget_bytes):
    """Largest lane-dense tile (multiple of 128) whose full working set fits
    the VMEM budget, soft-capped to keep >= 4 total grid steps."""
    per_token = (2 * F_g * in_item                    # g tile, double-buffered
                 + 2 * F_l * in_item                  # x tile, double-buffered
                 + 2 * F_l * in_item                  # out tile, double-buffered
                 + F_int * 4                          # gx / psi f32 intermediate
                 + (F_l * 4 if f32_epilogue else 0)   # f32 epilogue temp
                 + 8)                                 # logits / alpha rows
    # Resident weights + biases (counted 2x for headroom even though they are
    # requested single-buffered).
    weight_bytes = 2 * (F_int * (F_g + F_l) * w_item + 2 * F_int * 4 + 4)
    avail = max(budget_bytes - weight_bytes, per_token * 128)

    tm = avail // max(per_token, 1)
    tm = max(128, min(tm, 32768))                     # no artificial 2048 cap
    tm = (tm // 128) * 128
    tm = min(tm, _round_up(L, 128))

    # Keep at least ~4 grid steps total so ("parallel","parallel") can shard
    # across both v7x TensorCores (soft cap; ignored for tiny L).
    min_steps = 4
    if N < min_steps:
        s = -(-min_steps // N)                        # ceil(min_steps / N)
        if L >= s * 128:
            cap = ((-(-L // s)) // 128) * 128         # floor128(ceil(L/s))
            tm = min(tm, max(cap, 128))
    return max(tm, 128)


# ----------------------------------------------------------------------------
# Wrapper
# ----------------------------------------------------------------------------
def attention_block(g, x, params, *, tile_m=None):
    """g: (N, F_g, H, W), x: (N, F_l, H, W)  ->  (N, F_l, H, W)"""
    wg, bg, wx, bx, wp, bp = params
    N, F_g, H, W = g.shape
    _, F_l, _, _ = x.shape
    F_int = wg.shape[1]
    L = H * W
    in_item = jnp.dtype(x.dtype).itemsize
    w_item = jnp.dtype(wg.dtype).itemsize

    # f32 inputs keep the f32 epilogue multiply; bf16 inputs multiply in bf16
    # (native on v6e/v7x VPUs), alpha is still computed in f32.
    f32_epilogue = (x.dtype == jnp.float32)

    vmem_cap = _vmem_capacity_bytes()
    budget = (vmem_cap * 3) // 8                       # ~24 MiB v7x, ~48 MiB v5e/v6e
    vmem_limit = min((vmem_cap * 3) // 4, 96 << 20)    # 48 MiB v7x, 96 MiB v5e/v6e

    if tile_m is None:
        tile_m = _choose_tile_m(L, N, F_g, F_l, F_int, in_item, w_item,
                                f32_epilogue, budget)

    # NCHW -> (N, C, L): free reshape, no transpose, no extra HBM traffic.
    # NO padding: the grid uses cdiv and Pallas masks the partial last block.
    g_t = g.reshape(N, F_g, L)
    x_t = x.reshape(N, F_l, L)

    # Transposed (output-major) weights; fold the two input-conv biases; hoist
    # all f32 casts of the small operands out of the kernel.
    wgT = jnp.transpose(wg)                            # (F_int, F_g)
    wxT = jnp.transpose(wx)                            # (F_int, F_l)
    b_fold = (bg + bx).reshape(F_int, 1).astype(jnp.float32)
    wp_col = wp.reshape(F_int, 1).astype(jnp.float32)  # psi conv weight (col)
    bp2 = bp.reshape(1, 1).astype(jnp.float32)

    grid = (N, pl.cdiv(L, tile_m))

    # Advisory cost model for the XLA scheduler.
    M_tok = N * L
    cost = pl.CostEstimate(
        flops=2 * M_tok * F_int * (F_g + F_l + 1) + M_tok * F_l,
        transcendentals=M_tok,
        bytes_accessed=M_tok * (F_g + 2 * F_l) * in_item
        + (F_int * (F_g + F_l)) * w_item + (2 * F_int + 1) * 4,
    )

    def _run(single_buffer_weights):
        kw = dict(pipeline_mode=pl.Buffered(1)) if single_buffer_weights else {}
        const = lambda shape: pl.BlockSpec(shape, lambda n, i: (0, 0), **kw)
        return pl.pallas_call(
            functools.partial(_attention_kernel, f32_epilogue=f32_epilogue),
            out_shape=jax.ShapeDtypeStruct((N, F_l, L), x.dtype),
            grid_spec=pltpu.PrefetchScalarGridSpec(
                num_scalar_prefetch=0,
                grid=grid,
                in_specs=[
                    pl.BlockSpec((None, F_g, tile_m), lambda n, i: (n, 0, i)),  # g
                    pl.BlockSpec((None, F_l, tile_m), lambda n, i: (n, 0, i)),  # x
                    const((F_int, F_g)),        # W_g^T
                    const((F_int, F_l)),        # W_x^T
                    const((F_int, 1)),          # b_g + b_x (f32)
                    const((F_int, 1)),          # W_psi column (f32)
                    const((1, 1)),              # b_psi (f32)
                ],
                out_specs=pl.BlockSpec((None, F_l, tile_m),
                                       lambda n, i: (n, 0, i)),
            ),
            compiler_params=pltpu.CompilerParams(
                dimension_semantics=("parallel", "parallel"),
                vmem_limit_bytes=vmem_limit,
            ),
            cost_estimate=cost,
        )(g_t, x_t, wgT, wxT, b_fold, wp_col, bp2)

    try:
        out_t = _run(True)
    except Exception:
        # pipeline_mode=pl.Buffered(1) unsupported in this jax version:
        # fall back to default double-buffering (already accounted in budget).
        out_t = _run(False)

    # (N, F_l, L) -> (N, F_l, H, W): free reshape, nothing to slice off.
    return out_t.reshape(N, F_l, H, W)


# ----------------------------------------------------------------------------
# Pure-JAX reference of the PyTorch forward (sanity check).
# ----------------------------------------------------------------------------
def _reference(g, x, params):
    wg, bg, wx, bx, wp, bp = params
    g_tok = jnp.transpose(g, (0, 2, 3, 1))
    x_tok = jnp.transpose(x, (0, 2, 3, 1))
    g1 = g_tok @ wg + bg[0]
    x1 = x_tok @ wx + bx[0]
    psi = jnp.maximum(g1 + x1, 0.0)
    alpha = jax.nn.sigmoid(psi @ wp + bp[0])
    out = x_tok * alpha
    return jnp.transpose(out, (0, 3, 1, 2))


def make_params(key, F_g, F_l, F_int, dtype=jnp.float32):
    """Deterministic synthetic parameters.

    PyTorch Conv2d weight is (C_out, C_in, 1, 1); here we store the matmul
    form (C_in, C_out); the wrapper transposes for the token-on-lanes kernel.
    """
    k = jax.random.split(key, 6)
    wg = jax.random.normal(k[0], (F_g, F_int), dtype) * 0.1
    bg = jax.random.normal(k[1], (1, F_int), dtype) * 0.1
    wx = jax.random.normal(k[2], (F_l, F_int), dtype) * 0.1
    bx = jax.random.normal(k[3], (1, F_int), dtype) * 0.1
    wp = jax.random.normal(k[4], (F_int, 1), dtype) * 0.1
    bp = jax.random.normal(k[5], (1, 1), dtype) * 0.1
    return (wg, bg, wx, bx, wp, bp)


if __name__ == "__main__":
    key = jax.random.PRNGKey(0)

    # Case 1: divisible spatial extent (L = 256).
    N, F_g, F_l, F_int, H, W = 2, 4, 4, 8, 16, 16
    kg, kx, kp = jax.random.split(key, 3)
    g = jax.random.normal(kg, (N, F_g, H, W), jnp.float32)
    x = jax.random.normal(kx, (N, F_l, H, W), jnp.float32)
    params = make_params(kp, F_g, F_l, F_int)

    out = jax.block_until_ready(attention_block(g, x, params))
    ref = _reference(g, x, params)
    assert out.shape == (N, F_l, H, W)
    assert jnp.allclose(out, ref, atol=1e-5, rtol=1e-5), "mismatch vs reference"

    # Case 2: non-divisible spatial extent (L = 255) — exercises the padless
    # partial-last-block path (masked stores, no wrapper jnp.pad).
    H2, W2 = 15, 17
    kg2, kx2 = jax.random.split(kg, 2)
    g2 = jax.random.normal(kg2, (N, F_g, H2, W2), jnp.float32)
    x2 = jax.random.normal(kx2, (N, F_l, H2, W2), jnp.float32)
    out2 = jax.block_until_ready(attention_block(g2, x2, params))
    ref2 = _reference(g2, x2, params)
    assert out2.shape == (N, F_l, H2, W2)
    assert jnp.allclose(out2, ref2, atol=1e-5, rtol=1e-5), "mismatch (ragged)"

    print("KERNEL_OK")
</pallas_src>

<mosaic_0001>
module attributes {stable_mosaic.version = 11 : i64} {
  func.func @_attention_kernel(%arg0: i32, %arg1: i32, %arg2: memref<1x4x128xf32, #tpu.memory_space<vmem>>, %arg3: memref<1x4x128xf32, #tpu.memory_space<vmem>>, %arg4: memref<8x4xf32, #tpu.memory_space<vmem>>, %arg5: memref<8x4xf32, #tpu.memory_space<vmem>>, %arg6: memref<8x1xf32, #tpu.memory_space<vmem>>, %arg7: memref<8x1xf32, #tpu.memory_space<vmem>>, %arg8: memref<1x1xf32, #tpu.memory_space<vmem>>, %arg9: memref<1x4x128xf32, #tpu.memory_space<vmem>>) attributes {dimension_semantics = [#tpu.dimension_semantics<parallel>, #tpu.dimension_semantics<parallel>], iteration_bounds = array<i64: 2, 2>, scalar_prefetch = 0 : i64, scratch_operands = 0 : i64, tpu.core_type = #tpu.core_type<tc>, window_params = [{transform_indices = @transform_0, window_bounds = array<i64: 1, 4, 128>}, {transform_indices = @transform_1, window_bounds = array<i64: 1, 4, 128>}, {pipeline_mode = #tpu.pipeline_mode<synchronous>, transform_indices = @transform_2, window_bounds = array<i64: 8, 4>}, {pipeline_mode = #tpu.pipeline_mode<synchronous>, transform_indices = @transform_3, window_bounds = array<i64: 8, 4>}, {pipeline_mode = #tpu.pipeline_mode<synchronous>, transform_indices = @transform_4, window_bounds = array<i64: 8, 1>}, {pipeline_mode = #tpu.pipeline_mode<synchronous>, transform_indices = @transform_5, window_bounds = array<i64: 8, 1>}, {pipeline_mode = #tpu.pipeline_mode<synchronous>, transform_indices = @transform_6, window_bounds = array<i64: 1, 1>}, {transform_indices = @transform_7, window_bounds = array<i64: 1, 4, 128>}]} {
    %c0 = arith.constant 0 : index
    %c0_0 = arith.constant 0 : index
    %c0_1 = arith.constant 0 : index
    %0 = vector.load %arg2[%c0, %c0_0, %c0_1] : memref<1x4x128xf32, #tpu.memory_space<vmem>>, vector<1x4x128xf32>
    %1 = vector.shape_cast %0 : vector<1x4x128xf32> to vector<4x128xf32>
    %c0_2 = arith.constant 0 : index
    %c0_3 = arith.constant 0 : index
    %c0_4 = arith.constant 0 : index
    %2 = vector.load %arg3[%c0_2, %c0_3, %c0_4] : memref<1x4x128xf32, #tpu.memory_space<vmem>>, vector<1x4x128xf32>
    %3 = vector.shape_cast %2 : vector<1x4x128xf32> to vector<4x128xf32>
    %c0_5 = arith.constant 0 : index
    %c0_6 = arith.constant 0 : index
    %4 = vector.load %arg4[%c0_5, %c0_6] : memref<8x4xf32, #tpu.memory_space<vmem>>, vector<8x4xf32>
    %cst = arith.constant dense<0.000000e+00> : vector<8x128xf32>
    %5 = tpu.matmul %4, %1, %cst {dimension_numbers = #tpu.dot_dimension_numbers<[1], [0], [0], [1], [0, 0, 1, 1], [], []>} : vector<8x4xf32>, vector<4x128xf32>, vector<8x128xf32> -> vector<8x128xf32>
    %c0_7 = arith.constant 0 : index
    %c0_8 = arith.constant 0 : index
    %6 = vector.load %arg5[%c0_7, %c0_8] : memref<8x4xf32, #tpu.memory_space<vmem>>, vector<8x4xf32>
    %cst_9 = arith.constant dense<0.000000e+00> : vector<8x128xf32>
    %7 = tpu.matmul %6, %3, %cst_9 {dimension_numbers = #tpu.dot_dimension_numbers<[1], [0], [0], [1], [0, 0, 1, 1], [], []>} : vector<8x4xf32>, vector<4x128xf32>, vector<8x128xf32> -> vector<8x128xf32>
    %8 = arith.addf %5, %7 : vector<8x128xf32>
    %c0_10 = arith.constant 0 : index
    %c0_11 = arith.constant 0 : index
    %9 = vector.load %arg6[%c0_10, %c0_11] : memref<8x1xf32, #tpu.memory_space<vmem>>, vector<8x1xf32>
    %10 = vector.broadcast %9 : vector<8x1xf32> to vector<8x128xf32>
    %11 = arith.addf %8, %10 : vector<8x128xf32>
    %cst_12 = arith.constant 0.000000e+00 : f32
    %12 = vector.broadcast %cst_12 : f32 to vector<8x128xf32>
    %13 = arith.maximumf %11, %12 : vector<8x128xf32>
    %c0_13 = arith.constant 0 : index
    %c0_14 = arith.constant 0 : index
    %14 = vector.load %arg7[%c0_13, %c0_14] : memref<8x1xf32, #tpu.memory_space<vmem>>, vector<8x1xf32>
    %15 = vector.broadcast %14 : vector<8x1xf32> to vector<8x128xf32>
    %16 = arith.mulf %13, %15 : vector<8x128xf32>
    %cst_15 = arith.constant dense<0.000000e+00> : vector<128xf32>
    %17 = vector.multi_reduction <add>, %16, %cst_15 [0] : vector<8x128xf32> to vector<128xf32>
    %18 = vector.shape_cast %17 : vector<128xf32> to vector<1x128xf32>
    %c0_16 = arith.constant 0 : index
    %c0_17 = arith.constant 0 : index
    %19 = vector.load %arg8[%c0_16, %c0_17] : memref<1x1xf32, #tpu.memory_space<vmem>>, vector<1x1xf32>
    %20 = vector.broadcast %19 : vector<1x1xf32> to vector<1x128xf32>
    %21 = arith.addf %18, %20 : vector<1x128xf32>
    %22 = arith.negf %21 : vector<1x128xf32>
    %23 = math.exp %22 : vector<1x128xf32>
    %cst_18 = arith.constant 1.000000e+00 : f32
    %24 = vector.broadcast %cst_18 : f32 to vector<1x128xf32>
    %25 = arith.addf %24, %23 : vector<1x128xf32>
    %26 = arith.divf %24, %25 : vector<1x128xf32>
    %27 = vector.broadcast %26 : vector<1x128xf32> to vector<4x128xf32>
    %28 = arith.mulf %3, %27 : vector<4x128xf32>
    %c0_19 = arith.constant 0 : index
    %c0_20 = arith.constant 0 : index
    %c0_21 = arith.constant 0 : index
    %29 = vector.load %arg9[%c0_19, %c0_20, %c0_21] : memref<1x4x128xf32, #tpu.memory_space<vmem>>, vector<1x4x128xf32>
    %30 = vector.shape_cast %29 : vector<1x4x128xf32> to vector<4x128xf32>
    %31 = vector.shape_cast %28 : vector<4x128xf32> to vector<1x4x128xf32>
    tpu.vector_store %arg9[%c0_19, %c0_20, %c0_21], %31 {strides = array<i32>} : memref<1x4x128xf32, #tpu.memory_space<vmem>>, vector<1x4x128xf32>,
    return
  }
  func.func @transform_0(%arg0: i32, %arg1: i32) -> (i32, i32, i32) {
    %c0_i32 = arith.constant 0 : i32
    %c0_i32_0 = arith.constant 0 : i32
    return %arg0, %c0_i32, %arg1 : i32, i32, i32
  }
  func.func @transform_1(%arg0: i32, %arg1: i32) -> (i32, i32, i32) {
    %c0_i32 = arith.constant 0 : i32
    %c0_i32_0 = arith.constant 0 : i32
    return %arg0, %c0_i32, %arg1 : i32, i32, i32
  }
  func.func @transform_2(%arg0: i32, %arg1: i32) -> (i32, i32) {
    %c0_i32 = arith.constant 0 : i32
    %c0_i32_0 = arith.constant 0 : i32
    %c0_i32_1 = arith.constant 0 : i32
    return %c0_i32, %c0_i32_0 : i32, i32
  }
  func.func @transform_3(%arg0: i32, %arg1: i32) -> (i32, i32) {
    %c0_i32 = arith.constant 0 : i32
    %c0_i32_0 = arith.constant 0 : i32
    %c0_i32_1 = arith.constant 0 : i32
    return %c0_i32, %c0_i32_0 : i32, i32
  }
  func.func @transform_4(%arg0: i32, %arg1: i32) -> (i32, i32) {
    %c0_i32 = arith.constant 0 : i32
    %c0_i32_0 = arith.constant 0 : i32
    %c0_i32_1 = arith.constant 0 : i32
    return %c0_i32, %c0_i32_0 : i32, i32
  }
  func.func @transform_5(%arg0: i32, %arg1: i32) -> (i32, i32) {
    %c0_i32 = arith.constant 0 : i32
    %c0_i32_0 = arith.constant 0 : i32
    %c0_i32_1 = arith.constant 0 : i32
    return %c0_i32, %c0_i32_0 : i32, i32
  }
  func.func @transform_6(%arg0: i32, %arg1: i32) -> (i32, i32) {
    %c0_i32 = arith.constant 0 : i32
    %c0_i32_0 = arith.constant 0 : i32
    %c0_i32_1 = arith.constant 0 : i32
    return %c0_i32, %c0_i32_0 : i32, i32
  }
  func.func @transform_7(%arg0: i32, %arg1: i32) -> (i32, i32, i32) {
    %c0_i32 = arith.constant 0 : i32
    %c0_i32_0 = arith.constant 0 : i32
    return %arg0, %c0_i32, %arg1 : i32, i32, i32
  }
}

module attributes {stable_mosaic.version = 11 : i64} {
  func.func @_attention_kernel(%arg0: i32, %arg1: i32, %arg2: memref<1x4x128xf32, #tpu.memory_space<vmem>>, %arg3: memref<1x4x128xf32, #tpu.memory_space<vmem>>, %arg4: memref<8x4xf32, #tpu.memory_space<vmem>>, %arg5: memref<8x4xf32, #tpu.memory_space<vmem>>, %arg6: memref<8x1xf32, #tpu.memory_space<vmem>>, %arg7: memref<8x1xf32, #tpu.memory_space<vmem>>, %arg8: memref<1x1xf32, #tpu.memory_space<vmem>>, %arg9: memref<1x4x128xf32, #tpu.memory_space<vmem>>) attributes {dimension_semantics = [#tpu.dimension_semantics<parallel>, #tpu.dimension_semantics<parallel>], iteration_bounds = array<i64: 2, 2>, scalar_prefetch = 0 : i64, scratch_operands = 0 : i64, tpu.core_type = #tpu.core_type<tc>, window_params = [{transform_indices = @transform_0, window_bounds = array<i64: 1, 4, 128>}, {transform_indices = @transform_1, window_bounds = array<i64: 1, 4, 128>}, {pipeline_mode = #tpu.pipeline_mode<synchronous>, transform_indices = @transform_2, window_bounds = array<i64: 8, 4>}, {pipeline_mode = #tpu.pipeline_mode<synchronous>, transform_indices = @transform_3, window_bounds = array<i64: 8, 4>}, {pipeline_mode = #tpu.pipeline_mode<synchronous>, transform_indices = @transform_4, window_bounds = array<i64: 8, 1>}, {pipeline_mode = #tpu.pipeline_mode<synchronous>, transform_indices = @transform_5, window_bounds = array<i64: 8, 1>}, {pipeline_mode = #tpu.pipeline_mode<synchronous>, transform_indices = @transform_6, window_bounds = array<i64: 1, 1>}, {transform_indices = @transform_7, window_bounds = array<i64: 1, 4, 128>}]} {
    %c0 = arith.constant 0 : index
    %c0_0 = arith.constant 0 : index
    %c0_1 = arith.constant 0 : index
    %0 = vector.load %arg2[%c0, %c0_0, %c0_1] : memref<1x4x128xf32, #tpu.memory_space<vmem>>, vector<1x4x128xf32>
    %1 = vector.shape_cast %0 : vector<1x4x128xf32> to vector<4x128xf32>
    %c0_2 = arith.constant 0 : index
    %c0_3 = arith.constant 0 : index
    %c0_4 = arith.constant 0 : index
    %2 = vector.load %arg3[%c0_2, %c0_3, %c0_4] : memref<1x4x128xf32, #tpu.memory_space<vmem>>, vector<1x4x128xf32>
    %3 = vector.shape_cast %2 : vector<1x4x128xf32> to vector<4x128xf32>
    %c0_5 = arith.constant 0 : index
    %c0_6 = arith.constant 0 : index
    %4 = vector.load %arg4[%c0_5, %c0_6] : memref<8x4xf32, #tpu.memory_space<vmem>>, vector<8x4xf32>
    %cst = arith.constant dense<0.000000e+00> : vector<8x128xf32>
    %5 = tpu.matmul %4, %1, %cst {dimension_numbers = #tpu.dot_dimension_numbers<[1], [0], [0], [1], [0, 0, 1, 1], [], []>} : vector<8x4xf32>, vector<4x128xf32>, vector<8x128xf32> -> vector<8x128xf32>
    %c0_7 = arith.constant 0 : index
    %c0_8 = arith.constant 0 : index
    %6 = vector.load %arg5[%c0_7, %c0_8] : memref<8x4xf32, #tpu.memory_space<vmem>>, vector<8x4xf32>
    %cst_9 = arith.constant dense<0.000000e+00> : vector<8x128xf32>
    %7 = tpu.matmul %6, %3, %cst_9 {dimension_numbers = #tpu.dot_dimension_numbers<[1], [0], [0], [1], [0, 0, 1, 1], [], []>} : vector<8x4xf32>, vector<4x128xf32>, vector<8x128xf32> -> vector<8x128xf32>
    %8 = arith.addf %5, %7 : vector<8x128xf32>
    %c0_10 = arith.constant 0 : index
    %c0_11 = arith.constant 0 : index
    %9 = vector.load %arg6[%c0_10, %c0_11] : memref<8x1xf32, #tpu.memory_space<vmem>>, vector<8x1xf32>
    %10 = vector.broadcast %9 : vector<8x1xf32> to vector<8x128xf32>
    %11 = arith.addf %8, %10 : vector<8x128xf32>
    %cst_12 = arith.constant 0.000000e+00 : f32
    %12 = vector.broadcast %cst_12 : f32 to vector<8x128xf32>
    %13 = arith.maximumf %11, %12 : vector<8x128xf32>
    %c0_13 = arith.constant 0 : index
    %c0_14 = arith.constant 0 : index
    %14 = vector.load %arg7[%c0_13, %c0_14] : memref<8x1xf32, #tpu.memory_space<vmem>>, vector<8x1xf32>
    %15 = vector.broadcast %14 : vector<8x1xf32> to vector<8x128xf32>
    %16 = arith.mulf %13, %15 : vector<8x128xf32>
    %cst_15 = arith.constant dense<0.000000e+00> : vector<128xf32>
    %17 = vector.multi_reduction <add>, %16, %cst_15 [0] : vector<8x128xf32> to vector<128xf32>
    %18 = vector.shape_cast %17 : vector<128xf32> to vector<1x128xf32>
    %c0_16 = arith.constant 0 : index
    %c0_17 = arith.constant 0 : index
    %19 = vector.load %arg8[%c0_16, %c0_17] : memref<1x1xf32, #tpu.memory_space<vmem>>, vector<1x1xf32>
    %20 = vector.broadcast %19 : vector<1x1xf32> to vector<1x128xf32>
    %21 = arith.addf %18, %20 : vector<1x128xf32>
    %22 = arith.negf %21 : vector<1x128xf32>
    %23 = math.exp %22 : vector<1x128xf32>
    %cst_18 = arith.constant 1.000000e+00 : f32
    %24 = vector.broadcast %cst_18 : f32 to vector<1x128xf32>
    %25 = arith.addf %24, %23 : vector<1x128xf32>
    %26 = arith.divf %24, %25 : vector<1x128xf32>
    %27 = vector.broadcast %26 : vector<1x128xf32> to vector<4x128xf32>
    %28 = arith.mulf %3, %27 : vector<4x128xf32>
    %c0_19 = arith.constant 0 : index
    %c0_20 = arith.constant 0 : index
    %c0_21 = arith.constant 0 : index
    %29 = vector.load %arg9[%c0_19, %c0_20, %c0_21] : memref<1x4x128xf32, #tpu.memory_space<vmem>>, vector<1x4x128xf32>
    %30 = vector.shape_cast %29 : vector<1x4x128xf32> to vector<4x128xf32>
    %31 = vector.shape_cast %28 : vector<4x128xf32> to vector<1x4x128xf32>
    tpu.vector_store %arg9[%c0_19, %c0_20, %c0_21], %31 {strides = array<i32>} : memref<1x4x128xf32, #tpu.memory_space<vmem>>, vector<1x4x128xf32>,
    return
  }
  func.func @transform_0(%arg0: i32, %arg1: i32) -> (i32, i32, i32) {
    %c0_i32 = arith.constant 0 : i32
    %c0_i32_0 = arith.constant 0 : i32
    return %arg0, %c0_i32, %arg1 : i32, i32, i32
  }
  func.func @transform_1(%arg0: i32, %arg1: i32) -> (i32, i32, i32) {
    %c0_i32 = arith.constant 0 : i32
    %c0_i32_0 = arith.constant 0 : i32
    return %arg0, %c0_i32, %arg1 : i32, i32, i32
  }
  func.func @transform_2(%arg0: i32, %arg1: i32) -> (i32, i32) {
    %c0_i32 = arith.constant 0 : i32
    %c0_i32_0 = arith.constant 0 : i32
    %c0_i32_1 = arith.constant 0 : i32
    return %c0_i32, %c0_i32_0 : i32, i32
  }
  func.func @transform_3(%arg0: i32, %arg1: i32) -> (i32, i32) {
    %c0_i32 = arith.constant 0 : i32
    %c0_i32_0 = arith.constant 0 : i32
    %c0_i32_1 = arith.constant 0 : i32
    return %c0_i32, %c0_i32_0 : i32, i32
  }
  func.func @transform_4(%arg0: i32, %arg1: i32) -> (i32, i32) {
    %c0_i32 = arith.constant 0 : i32
    %c0_i32_0 = arith.constant 0 : i32
    %c0_i32_1 = arith.constant 0 : i32
    return %c0_i32, %c0_i32_0 : i32, i32
  }
  func.func @transform_5(%arg0: i32, %arg1: i32) -> (i32, i32) {
    %c0_i32 = arith.constant 0 : i32
    %c0_i32_0 = arith.constant 0 : i32
    %c0_i32_1 = arith.constant 0 : i32
    return %c0_i32, %c0_i32_0 : i32, i32
  }
  func.func @transform_6(%arg0: i32, %arg1: i32) -> (i32, i32) {
    %c0_i32 = arith.constant 0 : i32
    %c0_i32_0 = arith.constant 0 : i32
    %c0_i32_1 = arith.constant 0 : i32
    return %c0_i32, %c0_i32_0 : i32, i32
  }
  func.func @transform_7(%arg0: i32, %arg1: i32) -> (i32, i32, i32) {
    %c0_i32 = arith.constant 0 : i32
    %c0_i32_0 = arith.constant 0 : i32
    return %arg0, %c0_i32, %arg1 : i32, i32, i32
  }
}

</mosaic_0001>

<bundles_post_ra>
// kernel: tpu_custom_call.1
= control target key start
LH: loop header
LB: loop body
LE: loop exit
PB: predicated region body
PF: predicated region fallthrough
CT: control target
= control target key end

     0   :  { %s1039_s0 = inlined_call_operand.vmem [shape: f32[2,4,256], index: 0, kind: input, shape index: {}]   ;;  %s1040_s1 = inlined_call_operand.vmem [shape: f32[2,4,256], index: 1, kind: input, shape index: {}]   ;;  %s1041_s2 = inlined_call_operand.vmem [shape: f32[8,4], index: 2, kind: input, shape index: {}]   ;;  %s1042_s3 = inlined_call_operand.vmem [shape: f32[8,4], index: 3, kind: input, shape index: {}]   ;;  %s1043_s4 = inlined_call_operand.vmem [shape: f32[8,1], index: 4, kind: input, shape index: {}]   ;;  %s1044_s5 = inlined_call_operand.vmem [shape: f32[8,1], index: 5, kind: input, shape index: {}]   ;;  %s1045_s6 = inlined_call_operand.<no memory space> [shape: f32[1,1], index: 6, kind: input, shape index: {}]   ;;  %s1046_s7 = inlined_call_operand.hbm [shape: f32[2,4,256], index: 7, kind: output, shape index: {}]  }
   0x1   :  { %1050 = sst [smem:[#allocation9_spill]] %s1043_s4  ;;  %v12_v0 = vstv %s1045_s6 }
   0x2   :  { %13 = vst [vmem:[#allocation2] sm:$0x1] %v12_v0 }
   0x3   :  { %14 = vsyncpa [#allocation4], 0 }
   0x4   :  { %16 = vsyncpa [#allocation4 + $0x1], 0  ;;  %s900_s26 = smov 0   ;;  %s902_s27 = smov 0  }
   0x5   :  { %s904_s28 = smov 0   ;;  %s906_s29 = smov 0  }
   0x6   :  { %s908_s30 = smov 0   ;;  %s910_s8 = smov 0  }
   0x7   :  { %s912_s9 = smov 0   ;;  %s914_s10 = smov 0  }
   0x8 LB: > { %1051 = sst [smem:[#allocation6_spill]] %s847_s9  ;;  %s645_s6 = sadd.s32 4294967295, %s851_s10   ;;  %s851_s10 = sphi %s914_s10, %s22_s10   ;;  %s847_s9 = sphi %s912_s9, %s1059_s9   ;;  %s843_s8 = sphi %s910_s8, %s1064_s8   ;;  %s839_s30 = sphi %s908_s30, %s1057_s30   ;;  %s835_s29 = sphi %s906_s29, %s1063_s29   ;;  %s831_s28 = sphi %s904_s28, %s1062_s28   ;;  %s827_s27 = sphi %s902_s27, %s1061_s27   ;;  %s823_s26 = sphi %s900_s26, %s1060_s26  }
   0x9   : > { %s646_s11 = sadd.s32 4294967294, %s851_s10   ;;  %s31_s12 = sadd.s32 1, %s843_s8 }
   0xa   : > { %p32_p0 = scmp.ge.s32.totalorder %s31_s12, 2  ;;  %s34_s13 = sadd.s32 1, %s847_s9 }
   0xb   : > { %p214_p1 = scmp.ne.s32.totalorder %s831_s28, %s827_s27  ;;  %p215_p2 = scmp.eq.s32.totalorder %s645_s6, 3 }
   0xc   : > { %s1066_s12 = smov (%p32_p0, %s31_s12), 0  ;;  %s1068_s13 = smov (!%p32_p0, %s34_s13), %s847_s9 }
   0xd   : > { %1052 = sst [smem:[#allocation7_spill]] %s1066_s12  ;;  %s200_s14 = ssub.s32 %s843_s8, %s1066_s12 }
   0xe   : > { %p951_p3 = por %p215_p2, %p214_p1  ;;  %p36_p4 = scmp.ge.s32.totalorder %s1068_s13, 2 }
   0xf   : > { %p220_p5 = scmp.ne.s32.totalorder %s827_s27, %s823_s26  ;;  %p221_p6 = scmp.eq.s32.totalorder %s646_s11, 3 }
  0x10   : > { %p649_p7 = scmp.ge.s32.totalorder %s851_s10, 1  ;;  %s1070_s13 = smov (%p36_p4, %s1068_s13), 0 }
  0x11   : > { %1054 = sst [smem:[#allocation8_spill]] %s1070_s13  ;;  %p960_p8 = por %p221_p6, %p220_p5 }
  0x12   : > { %p276_p9 = scmp.lt.s32.totalorder %s851_s10, 5  ;;  %s199_s17 = ssub.s32 %s847_s9, %s1070_s13 }
  0x13   : > { %s204_s18 = sadd.s32 1, %s831_s28  ;;  %s201_s19 = sor.u32 %s200_s14, %s199_s17 }
  0x14   : > { %p277_p10 = pnand %p649_p7, %p276_p9  ;;  %p202_p11 = scmp.eq.s32.totalorder %s201_s19, 0 }
  0x15   : > { %p319_p12 = scmp.lt.s32.totalorder (!%p277_p10), %s839_s30, 1  ;;  %p321_p13 = scmp.lt.s32.totalorder (!%p277_p10), %s835_s29, 1 }
  0x16   : > { %s969_s20 = scalar_select %p202_p11, %s831_s28, %s204_s18  }
  0x17   : > { %280 = sbr.rel (%p277_p10) target bundleno = 299 (0x12b), region = 48  ;;  %s1056_s4 = sld [smem:[#allocation9_spill]] (!%p277_p10) }
  0x18   : > { %s661_s12 = sshll.u32 (!%p277_p10), %s839_s30, 1  ;;  %s856_s22 = smov (!%p277_p10), [#allocation3]  }
  0x1c   : > { %v853_v1 = vmov 0.0   ;;  %s320_s23 = scalar_select %p319_p12, %s839_s30, 1  ;;  %vm854_vm0 = vmmov 0   ;;  %v514_v3 = vld [vmem:[#allocation2] sm:$0x1]  ;;  %v855_v4 = vmov 0   ;;  %v520_v18 = vlaneseq }
  0x1d   : > { %669 = vmatprep.subr.mxu0 %v853_v1  ;;  %674 = vmatprep.subr.mxu1 %v853_v1  ;;  %v493_v2 = vld [vmem:[%s1056_s4] sm:$0xff]  ;;  %s322_s24 = scalar_select %p321_p13, %s835_s29, 1  ;;  %vm343_vm1 = vcmask 1043456   ;;  %vm339_vm2 = vcmask 31744  }
  0x1e   : > { %671 = vmatprep.mubr.msk.f32.mxu0 %vm854_vm0, %v853_v1  ;;  %676 = vmatprep.mubr.msk.f32.mxu1 %vm854_vm0, %v853_v1  ;;  %s651_s25 = sshll.u32 %s320_s23, 1  ;;  %v501_v5 = vld [vmem:[%s1044_s5] sm:$0xff]  ;;  %v521_v22 = vshrl.u32 %v520_v18, 7  ;;  %s316_s4 = sand.u32 1, %s827_s27  }
  0x1f   : > { %753 = vset.pattern.permute.xlu0 %v855_v4  ;;  %754 = vset.pattern.permute.xlu1 %v855_v4  ;;  %s324_s6 = sadd.s32 %s651_s25, %s322_s24  ;;  %v338_v6 = vld [vmem:[%s1042_s3] sm:$0xff]  ;;  %s650_s9 = sshll.u32 %s316_s4, 2 }
  0x20   : > { %496 = vperm.xlu0 %753, %v493_v2   ;;  %517 = vperm.xlu1 %754, %v514_v3   ;;  %s652_s17 = sshll.u32 %s324_s6, 2  ;;  %v337_v7 = vld [vmem:[%s1041_s2] sm:$0xff]  ;;  %v522_v25 = vsub.s32 0, %v521_v22  ;;  %s318_s6 = scalar_lea.vmem [#allocation3], %s650_s9 }
  0x21   : > { %s334_s21 = scalar_lea.vmem %s1040_s1, %s652_s17  ;;  %s326_s13 = scalar_lea.vmem %s1039_s0, %s652_s17 }
  0x22   : > { %v336_v8 = vld [vmem:[%s334_s21] sm:$0xf]  ;;  %s549_s11 = sshll.u32 %s318_s6, 4  ;;  %s534_s19 = scalar_lea.sflag [#allocation4], %s316_s4  ;;  %s550_s11 = int_to_ptr.vmem [resolvable:$true] %s549_s11 }
  0x23   : > { %v335_v9 = vld [vmem:[%s326_s13] sm:$0xf]  ;;  %670 = vmatpush3.msk.msra.mxu0 %vm343_vm1, %v336_v8  ;;  %s545_s13 = sadd.s32 %s835_s29, %s661_s12  ;;  %s759_s21 = scalar_lea.vmem %s550_s11, 64 }
  0x24   : > { %504 = vperm.xlu0 %753, %v501_v5   ;;  %675 = vmatpush3.msk.msra.mxu1 %vm343_vm1, %v335_v9  ;;  %s662_s25 = sshll.u32 %s545_s13, 6  ;;  %p760_p0 = scmp.ne.s32.totalorder %s550_s11, %s759_s21 }
  0x25   : > { %672 = vmatmul.mubr.msk.f32.vlgmr.msra.gmra.mxu0 %vm339_vm2, %v338_v6  ;;  %677 = vmatmul.mubr.msk.f32.vlgmr.msra.gmra.mxu1 %vm339_vm2, %v337_v7  ;;  %s547_s18 = scalar_lea.hbm %s1046_s7, %s662_s25  ;;  %s763_s30 = sshll.u32 %s856_s22, 4  ;;  %s764_s30 = int_to_ptr.vmem [resolvable:$false] %s763_s30 }
  0x26   : > { %p761_p1 = pnand %p760_p0, %p951_p3  ;;  %s765_s29 = scalar_lea.vmem %s764_s30, 128 }
  0x27   : > { %p766_p4 = scmp.lt.s32.totalorder %s550_s11, %s764_s30  ;;  %p767_p5 = scmp.lt.s32.totalorder %s765_s29, %s759_s21 }
  0x28   : > { %p762_p2 = pneg %p761_p1 }
  0x29   : > { %p768_p6 = por %p767_p5, %p766_p4 }
  0x2b   : > { %p769_p7 = pnand %p768_p6, %p762_p2 }
  0x9b   : > { %v497_v10 = vpop.permute.xlu0 %496  ;;  %v518_v26 = vpop.permute.xlu1 %517 }
  0x9c   : > { %v523_v29 = vrot.slane %v518_v26, %v522_v25 }
  0x9f   : > { %v505_v19 = vpop.permute.xlu0 %504 }
  0xe5   : > { %v413_v11 = vpop.f32.mrf.mxu0  ;;  %v489_v12 = vpop.f32.mrf.mxu1 }
  0xe6   : > { %v490_v13 = vadd.f32 %v489_v12, %v413_v11 }
  0xe7   : > { %v673_v14 = vpop.f32.mrf.mxu0  ;;  %v678_v15 = vpop.f32.mrf.mxu1 }
  0xe8   : > { %v499_v16 = vadd.f32 %v497_v10, %v490_v13 }
  0xea   : > { %v500_v17 = vmax.f32 %v499_v16, 0.0 }
  0xec   : > { %v507_v20 = vmul.f32 %v505_v19, %v500_v17 }
  0xee   : > { %v508_v21 = vrot.slane %v507_v20, 4 }
  0xf0   : > { %v509_v23 = vadd.f32 %v508_v21, %v507_v20 }
  0xf2   : > { %v510_v24 = vrot.slane %v509_v23, 2 }
  0xf4   : > { %v511_v27 = vadd.f32 %v510_v24, %v509_v23 }
  0xf6   : > { %v512_v28 = vrot.slane %v511_v27, 1 }
  0xf8   : > { %v513_v30 = vadd.f32 %v512_v28, %v511_v27 }
  0xfa   : > { %v524_v31 = vadd.f32 %v523_v29, %v513_v30 }
  0xfc   : > { %v659_v32 = vmul.f32 -1.442695, %v524_v31 }
  0xfe   : > { %755 = vpow2.f32 %v659_v32 }
 0x10b   : > { %v756_v33 = vpop.eup %755 }
 0x10c   : > { %v528_v34 = vadd.f32 1.0, %v756_v33 }
 0x10e   : > { %757 = vrcp.f32 %v528_v34 }
 0x11b   : > { %v758_v35 = vpop.eup %757 }
 0x11c   : > { %v531_v36 = vmul.f32 %v758_v35, %v336_v8 }
 0x11e   : > { %532 = vst [vmem:[%s318_s6] sm:$0xf] %v531_v36 }
 0x11f   : > { %772 = shalt.err (!%p769_p7)
}
 0x120   : > { %s773_s23 = scalar_lea.hbm %s547_s18, 64  ;;  %s777_s9 = scalar_lea.hbm %s1046_s7, 256 }
 0x121   : > { %p774_p9 = scmp.ne.s32.totalorder %s547_s18, %s773_s23  ;;  %p778_p12 = scmp.lt.s32.totalorder %s547_s18, %s1046_s7 }
 0x122   : > { %p779_p13 = scmp.lt.s32.totalorder %s777_s9, %s773_s23 }
 0x123   : > { %p775_p10 = pnand %p774_p9, %p951_p3 }
 0x124   : > { %p780_p0 = por %p779_p13, %p778_p12 }
 0x125   : > { %p776_p11 = pneg %p775_p10 }
 0x127   : > { %p781_p1 = pnand %p780_p0, %p776_p11 }
 0x129   : > { %784 = shalt.err (!%p781_p1)
}
 0x12a   : > { %679 = dma.vmem_to_hbm [thread:$0]  (%p951_p3), %s550_s11, 64, %s547_s18, %s534_s19  }
 0x12b PF: > { %p685_p2 = scmp.ge.s32.totalorder %s851_s10, 2  ;;  %s561_s25 = sand.u32 1, %s823_s26  }
 0x12c   : > { %s562_s6 = scalar_lea.sflag [#allocation4], %s561_s25 }
 0x12d   : > { %p682_p4 = pnand %p685_p2, %p960_p8 }
 0x12f   : > { %p683_p5 = pneg %p682_p4 }
 0x131   : > { %818 = dma.done.wait (%p683_p5), %s562_s6, 64  }
 0x132   : > { %820 = vsyncadd (%p683_p5), %s562_s6, 4294967232  ;;  %s22_s10 = sadd.s32 1, %s851_s10   ;;  %s1057_s30 = sld [smem:[#allocation6_spill]] }
 0x133   : > { %p19_p6 = scmp.ge.s32.totalorder %s22_s10, 6   ;;  %s1058_s15 = sld [smem:[#allocation7_spill]] }
 0x134   : > { %s1059_s9 = sld [smem:[#allocation8_spill]]  ;;  %s1060_s26 = smov %s827_s27 }
 0x135   : > { %s1061_s27 = smov %s831_s28  ;;  %s1062_s28 = smov %s969_s20 }
 0x136   : > { %s1063_s29 = smov %s843_s8  ;;  %21 = sbr.rel (!%p19_p6) target bundleno = 8 (0x8), region = 86 }
 0x139   : > { %s1064_s8 = smov %s1058_s15 }
 0x13b   :  { %567 = vsyncpa [#allocation4], 1 }
 0x13c   :  { %569 = vsyncpa [#allocation4 + $0x1], 1 }

// kernel: tpu_custom_call.1
= control target key start
LH: loop header
LB: loop body
LE: loop exit
PB: predicated region body
PF: predicated region fallthrough
CT: control target
= control target key end

     0   :  { %s1039_s0 = inlined_call_operand.vmem [shape: f32[2,4,256], index: 0, kind: input, shape index: {}]   ;;  %s1040_s1 = inlined_call_operand.vmem [shape: f32[2,4,256], index: 1, kind: input, shape index: {}]   ;;  %s1041_s2 = inlined_call_operand.vmem [shape: f32[8,4], index: 2, kind: input, shape index: {}]   ;;  %s1042_s3 = inlined_call_operand.vmem [shape: f32[8,4], index: 3, kind: input, shape index: {}]   ;;  %s1043_s4 = inlined_call_operand.vmem [shape: f32[8,1], index: 4, kind: input, shape index: {}]   ;;  %s1044_s5 = inlined_call_operand.vmem [shape: f32[8,1], index: 5, kind: input, shape index: {}]   ;;  %s1045_s6 = inlined_call_operand.<no memory space> [shape: f32[1,1], index: 6, kind: input, shape index: {}]   ;;  %s1046_s7 = inlined_call_operand.hbm [shape: f32[2,4,256], index: 7, kind: output, shape index: {}]  }
   0x1   :  { %1050 = sst [smem:[#allocation9_spill]] %s1043_s4  ;;  %v12_v0 = vstv %s1045_s6 }
   0x2   :  { %13 = vst [vmem:[#allocation2] sm:$0x1] %v12_v0 }
   0x3   :  { %14 = vsyncpa [#allocation4], 0 }
   0x4   :  { %16 = vsyncpa [#allocation4 + $0x1], 0  ;;  %s900_s26 = smov 0   ;;  %s902_s27 = smov 0  }
   0x5   :  { %s904_s28 = smov 0   ;;  %s906_s29 = smov 0  }
   0x6   :  { %s908_s30 = smov 0   ;;  %s910_s8 = smov 0  }
   0x7   :  { %s912_s9 = smov 0   ;;  %s914_s10 = smov 0  }
   0x8 LB: > { %1051 = sst [smem:[#allocation6_spill]] %s847_s9  ;;  %s645_s6 = sadd.s32 4294967295, %s851_s10   ;;  %s851_s10 = sphi %s914_s10, %s22_s10   ;;  %s847_s9 = sphi %s912_s9, %s1059_s9   ;;  %s843_s8 = sphi %s910_s8, %s1064_s8   ;;  %s839_s30 = sphi %s908_s30, %s1057_s30   ;;  %s835_s29 = sphi %s906_s29, %s1063_s29   ;;  %s831_s28 = sphi %s904_s28, %s1062_s28   ;;  %s827_s27 = sphi %s902_s27, %s1061_s27   ;;  %s823_s26 = sphi %s900_s26, %s1060_s26  }
   0x9   : > { %s646_s11 = sadd.s32 4294967294, %s851_s10   ;;  %s31_s12 = sadd.s32 1, %s843_s8 }
   0xa   : > { %p32_p0 = scmp.ge.s32.totalorder %s31_s12, 2  ;;  %s34_s13 = sadd.s32 1, %s847_s9 }
   0xb   : > { %p214_p1 = scmp.ne.s32.totalorder %s831_s28, %s827_s27  ;;  %p215_p2 = scmp.eq.s32.totalorder %s645_s6, 3 }
   0xc   : > { %s1066_s12 = smov (%p32_p0, %s31_s12), 0  ;;  %s1068_s13 = smov (!%p32_p0, %s34_s13), %s847_s9 }
   0xd   : > { %1052 = sst [smem:[#allocation7_spill]] %s1066_s12  ;;  %s200_s14 = ssub.s32 %s843_s8, %s1066_s12 }
   0xe   : > { %p951_p3 = por %p215_p2, %p214_p1  ;;  %p36_p4 = scmp.ge.s32.totalorder %s1068_s13, 2 }
   0xf   : > { %p220_p5 = scmp.ne.s32.totalorder %s827_s27, %s823_s26  ;;  %p221_p6 = scmp.eq.s32.totalorder %s646_s11, 3 }
  0x10   : > { %p649_p7 = scmp.ge.s32.totalorder %s851_s10, 1  ;;  %s1070_s13 = smov (%p36_p4, %s1068_s13), 0 }
  0x11   : > { %1054 = sst [smem:[#allocation8_spill]] %s1070_s13  ;;  %p960_p8 = por %p221_p6, %p220_p5 }
  0x12   : > { %p276_p9 = scmp.lt.s32.totalorder %s851_s10, 5  ;;  %s199_s17 = ssub.s32 %s847_s9, %s1070_s13 }
  0x13   : > { %s204_s18 = sadd.s32 1, %s831_s28  ;;  %s201_s19 = sor.u32 %s200_s14, %s199_s17 }
  0x14   : > { %p277_p10 = pnand %p649_p7, %p276_p9  ;;  %p202_p11 = scmp.eq.s32.totalorder %s201_s19, 0 }
  0x15   : > { %p319_p12 = scmp.lt.s32.totalorder (!%p277_p10), %s839_s30, 1  ;;  %p321_p13 = scmp.lt.s32.totalorder (!%p277_p10), %s835_s29, 1 }
  0x16   : > { %s969_s20 = scalar_select %p202_p11, %s831_s28, %s204_s18  }
  0x17   : > { %280 = sbr.rel (%p277_p10) target bundleno = 299 (0x12b), region = 48  ;;  %s1056_s4 = sld [smem:[#allocation9_spill]] (!%p277_p10) }
  0x18   : > { %s661_s12 = sshll.u32 (!%p277_p10), %s839_s30, 1  ;;  %s856_s22 = smov (!%p277_p10), [#allocation3]  }
  0x1c   : > { %v853_v1 = vmov 0.0   ;;  %s320_s23 = scalar_select %p319_p12, %s839_s30, 1  ;;  %vm854_vm0 = vmmov 0   ;;  %v514_v3 = vld [vmem:[#allocation2] sm:$0x1]  ;;  %v855_v4 = vmov 0   ;;  %v520_v18 = vlaneseq }
  0x1d   : > { %669 = vmatprep.subr.mxu0 %v853_v1  ;;  %674 = vmatprep.subr.mxu1 %v853_v1  ;;  %v493_v2 = vld [vmem:[%s1056_s4] sm:$0xff]  ;;  %s322_s24 = scalar_select %p321_p13, %s835_s29, 1  ;;  %vm343_vm1 = vcmask 1043456   ;;  %vm339_vm2 = vcmask 31744  }
  0x1e   : > { %671 = vmatprep.mubr.msk.f32.mxu0 %vm854_vm0, %v853_v1  ;;  %676 = vmatprep.mubr.msk.f32.mxu1 %vm854_vm0, %v853_v1  ;;  %s651_s25 = sshll.u32 %s320_s23, 1  ;;  %v501_v5 = vld [vmem:[%s1044_s5] sm:$0xff]  ;;  %v521_v22 = vshrl.u32 %v520_v18, 7  ;;  %s316_s4 = sand.u32 1, %s827_s27  }
  0x1f   : > { %753 = vset.pattern.permute.xlu0 %v855_v4  ;;  %754 = vset.pattern.permute.xlu1 %v855_v4  ;;  %s324_s6 = sadd.s32 %s651_s25, %s322_s24  ;;  %v338_v6 = vld [vmem:[%s1042_s3] sm:$0xff]  ;;  %s650_s9 = sshll.u32 %s316_s4, 2 }
  0x20   : > { %496 = vperm.xlu0 %753, %v493_v2   ;;  %517 = vperm.xlu1 %754, %v514_v3   ;;  %s652_s17 = sshll.u32 %s324_s6, 2  ;;  %v337_v7 = vld [vmem:[%s1041_s2] sm:$0xff]  ;;  %v522_v25 = vsub.s32 0, %v521_v22  ;;  %s318_s6 = scalar_lea.vmem [#allocation3], %s650_s9 }
  0x21   : > { %s334_s21 = scalar_lea.vmem %s1040_s1, %s652_s17  ;;  %s326_s13 = scalar_lea.vmem %s1039_s0, %s652_s17 }
  0x22   : > { %v336_v8 = vld [vmem:[%s334_s21] sm:$0xf]  ;;  %s549_s11 = sshll.u32 %s318_s6, 4  ;;  %s534_s19 = scalar_lea.sflag [#allocation4], %s316_s4  ;;  %s550_s11 = int_to_ptr.vmem [resolvable:$true] %s549_s11 }
  0x23   : > { %v335_v9 = vld [vmem:[%s326_s13] sm:$0xf]  ;;  %670 = vmatpush3.msk.msra.mxu0 %vm343_vm1, %v336_v8  ;;  %s545_s13 = sadd.s32 %s835_s29, %s661_s12  ;;  %s759_s21 = scalar_lea.vmem %s550_s11, 64 }
  0x24   : > { %504 = vperm.xlu0 %753, %v501_v5   ;;  %675 = vmatpush3.msk.msra.mxu1 %vm343_vm1, %v335_v9  ;;  %s662_s25 = sshll.u32 %s545_s13, 6  ;;  %p760_p0 = scmp.ne.s32.totalorder %s550_s11, %s759_s21 }
  0x25   : > { %672 = vmatmul.mubr.msk.f32.vlgmr.msra.gmra.mxu0 %vm339_vm2, %v338_v6  ;;  %677 = vmatmul.mubr.msk.f32.vlgmr.msra.gmra.mxu1 %vm339_vm2, %v337_v7  ;;  %s547_s18 = scalar_lea.hbm %s1046_s7, %s662_s25  ;;  %s763_s30 = sshll.u32 %s856_s22, 4  ;;  %s764_s30 = int_to_ptr.vmem [resolvable:$false] %s763_s30 }
  0x26   : > { %p761_p1 = pnand %p760_p0, %p951_p3  ;;  %s765_s29 = scalar_lea.vmem %s764_s30, 128 }
  0x27   : > { %p766_p4 = scmp.lt.s32.totalorder %s550_s11, %s764_s30  ;;  %p767_p5 = scmp.lt.s32.totalorder %s765_s29, %s759_s21 }
  0x28   : > { %p762_p2 = pneg %p761_p1 }
  0x29   : > { %p768_p6 = por %p767_p5, %p766_p4 }
  0x2b   : > { %p769_p7 = pnand %p768_p6, %p762_p2 }
  0x9b   : > { %v497_v10 = vpop.permute.xlu0 %496  ;;  %v518_v26 = vpop.permute.xlu1 %517 }
  0x9c   : > { %v523_v29 = vrot.slane %v518_v26, %v522_v25 }
  0x9f   : > { %v505_v19 = vpop.permute.xlu0 %504 }
  0xe5   : > { %v413_v11 = vpop.f32.mrf.mxu0  ;;  %v489_v12 = vpop.f32.mrf.mxu1 }
  0xe6   : > { %v490_v13 = vadd.f32 %v489_v12, %v413_v11 }
  0xe7   : > { %v673_v14 = vpop.f32.mrf.mxu0  ;;  %v678_v15 = vpop.f32.mrf.mxu1 }
  0xe8   : > { %v499_v16 = vadd.f32 %v497_v10, %v490_v13 }
  0xea   : > { %v500_v17 = vmax.f32 %v499_v16, 0.0 }
  0xec   : > { %v507_v20 = vmul.f32 %v505_v19, %v500_v17 }
  0xee   : > { %v508_v21 = vrot.slane %v507_v20, 4 }
  0xf0   : > { %v509_v23 = vadd.f32 %v508_v21, %v507_v20 }
  0xf2   : > { %v510_v24 = vrot.slane %v509_v23, 2 }
  0xf4   : > { %v511_v27 = vadd.f32 %v510_v24, %v509_v23 }
  0xf6   : > { %v512_v28 = vrot.slane %v511_v27, 1 }
  0xf8   : > { %v513_v30 = vadd.f32 %v512_v28, %v511_v27 }
  0xfa   : > { %v524_v31 = vadd.f32 %v523_v29, %v513_v30 }
  0xfc   : > { %v659_v32 = vmul.f32 -1.442695, %v524_v31 }
  0xfe   : > { %755 = vpow2.f32 %v659_v32 }
 0x10b   : > { %v756_v33 = vpop.eup %755 }
 0x10c   : > { %v528_v34 = vadd.f32 1.0, %v756_v33 }
 0x10e   : > { %757 = vrcp.f32 %v528_v34 }
 0x11b   : > { %v758_v35 = vpop.eup %757 }
 0x11c   : > { %v531_v36 = vmul.f32 %v758_v35, %v336_v8 }
 0x11e   : > { %532 = vst [vmem:[%s318_s6] sm:$0xf] %v531_v36 }
 0x11f   : > { %772 = shalt.err (!%p769_p7)
}
 0x120   : > { %s773_s23 = scalar_lea.hbm %s547_s18, 64  ;;  %s777_s9 = scalar_lea.hbm %s1046_s7, 256 }
 0x121   : > { %p774_p9 = scmp.ne.s32.totalorder %s547_s18, %s773_s23  ;;  %p778_p12 = scmp.lt.s32.totalorder %s547_s18, %s1046_s7 }
 0x122   : > { %p779_p13 = scmp.lt.s32.totalorder %s777_s9, %s773_s23 }
 0x123   : > { %p775_p10 = pnand %p774_p9, %p951_p3 }
 0x124   : > { %p780_p0 = por %p779_p13, %p778_p12 }
 0x125   : > { %p776_p11 = pneg %p775_p10 }
 0x127   : > { %p781_p1 = pnand %p780_p0, %p776_p11 }
 0x129   : > { %784 = shalt.err (!%p781_p1)
}
 0x12a   : > { %679 = dma.vmem_to_hbm [thread:$0]  (%p951_p3), %s550_s11, 64, %s547_s18, %s534_s19  }
 0x12b PF: > { %p685_p2 = scmp.ge.s32.totalorder %s851_s10, 2  ;;  %s561_s25 = sand.u32 1, %s823_s26  }
 0x12c   : > { %s562_s6 = scalar_lea.sflag [#allocation4], %s561_s25 }
 0x12d   : > { %p682_p4 = pnand %p685_p2, %p960_p8 }
 0x12f   : > { %p683_p5 = pneg %p682_p4 }
 0x131   : > { %818 = dma.done.wait (%p683_p5), %s562_s6, 64  }
 0x132   : > { %820 = vsyncadd (%p683_p5), %s562_s6, 4294967232  ;;  %s22_s10 = sadd.s32 1, %s851_s10   ;;  %s1057_s30 = sld [smem:[#allocation6_spill]] }
 0x133   : > { %p19_p6 = scmp.ge.s32.totalorder %s22_s10, 6   ;;  %s1058_s15 = sld [smem:[#allocation7_spill]] }
 0x134   : > { %s1059_s9 = sld [smem:[#allocation8_spill]]  ;;  %s1060_s26 = smov %s827_s27 }
 0x135   : > { %s1061_s27 = smov %s831_s28  ;;  %s1062_s28 = smov %s969_s20 }
 0x136   : > { %s1063_s29 = smov %s843_s8  ;;  %21 = sbr.rel (!%p19_p6) target bundleno = 8 (0x8), region = 86 }
 0x139   : > { %s1064_s8 = smov %s1058_s15 }
 0x13b   :  { %567 = vsyncpa [#allocation4], 1 }
 0x13c   :  { %569 = vsyncpa [#allocation4 + $0x1], 1 }

</bundles_post_ra>
